<compile_context>
chip_gen: v7x
topology: tpu7x:2x2x1
jax: 0.10.0
libtpu: 0.0.40
codegen_flags: <defaults>
</compile_context>

<pallas_src>
import jax
import jax.numpy as jnp
from jax.experimental import pallas as pl
from jax.experimental.pallas import tpu as pltpu

HIDDEN_DIM = 32
DATA_DIM = 16
LAYER_DIMS = [HIDDEN_DIM, 64, 256, 256, 64, DATA_DIM]  # 2**6, 2**8, 2**8, 2**6
LEAKY_SLOPE = 0.02            # matches nn.LeakyReLU(0.02) in the original module
ROW_ALIGN = 16                # bf16 sublane packing friendly
MAX_TILE_M = 2048             # amortizes ~0.35us/step grid overhead, ~<6 MiB VMEM


# ----------------------------------------------------------------------------- kernel
def decoder_kernel(x_ref,
                   w1_ref, b1_ref,
                   w2_ref, b2_ref,
                   w3_ref, b3_ref,
                   w4_ref, b4_ref,
                   w5_ref, b5_ref,
                   o_ref):
    def layer(h_bf16, w_ref, b_ref):
        # bf16 x bf16 operands, f32 accumulation on the MXU.
        acc = jnp.dot(h_bf16, w_ref[...], preferred_element_type=jnp.float32)
        return acc + b_ref[...]

    def leaky_to_bf16(acc):
        # Bias + LeakyReLU epilogue in f32, single cast to bf16 for the next matmul.
        return jnp.where(acc > 0, acc, LEAKY_SLOPE * acc).astype(jnp.bfloat16)

    h = x_ref[...]  # already bf16 (cast in the wrapper)
    h = leaky_to_bf16(layer(h, w1_ref, b1_ref))
    h = leaky_to_bf16(layer(h, w2_ref, b2_ref))
    h = leaky_to_bf16(layer(h, w3_ref, b3_ref))
    h = leaky_to_bf16(layer(h, w4_ref, b4_ref))
    acc = layer(h, w5_ref, b5_ref)
    o_ref[...] = jnp.tanh(acc).astype(o_ref.dtype)


# ----------------------------------------------------------------------------- params
def init_params(key):
    """nn.Linear-style init U(-1/sqrt(fan_in), 1/sqrt(fan_in)).
    Weights stored as (in, out) in bf16 (MXU fast path); biases f32 (1, out)."""
    params = []
    for i in range(len(LAYER_DIMS) - 1):
        fan_in, fan_out = LAYER_DIMS[i], LAYER_DIMS[i + 1]
        key, kw, kb = jax.random.split(key, 3)
        bound = 1.0 / jnp.sqrt(jnp.float32(fan_in))
        w = jax.random.uniform(kw, (fan_in, fan_out), jnp.float32, -bound, bound)
        b = jax.random.uniform(kb, (1, fan_out), jnp.float32, -bound, bound)
        params.append((w.astype(jnp.bfloat16), b))
    return params


# ------------------------------------------------------------------------- tile choice
def _round_up(x, m):
    return (x + m - 1) // m * m


def _choose_tile_m(batch):
    """Single grid step for small/medium batches (no forced >=2 steps: useless on
    single-TC v5e/v6e).  For large batches prefer a tile that divides the batch
    exactly (no pad copy), with a preference for an even block count (v7x
    megacore load balance)."""
    b_aligned = _round_up(batch, ROW_ALIGN)
    if b_aligned <= MAX_TILE_M:
        return b_aligned
    candidates = (2048, 1024, 512, 256, 128)
    even_div = [c for c in candidates if batch % c == 0 and (batch // c) % 2 == 0]
    if even_div:
        return even_div[0]
    any_div = [c for c in candidates if batch % c == 0]
    if any_div:
        return any_div[0]
    return MAX_TILE_M


# ------------------------------------------------------------------------------ build
def _build_call(tm, n_blocks, b_pad, params, out_dtype, single_buffer_weights):
    def const_spec(shape):
        if single_buffer_weights:
            # Constant across the grid -> no point double-buffering.
            return pl.BlockSpec(shape, lambda i: (0, 0), pipeline_mode=pl.Buffered(1))
        return pl.BlockSpec(shape, lambda i: (0, 0))

    in_specs = [pl.BlockSpec((tm, HIDDEN_DIM), lambda i: (i, 0))]
    for (w, b) in params:
        in_specs.append(const_spec(w.shape))
        in_specs.append(const_spec(b.shape))
    out_spec = pl.BlockSpec((tm, DATA_DIM), lambda i: (i, 0))

    return pl.pallas_call(
        decoder_kernel,
        out_shape=jax.ShapeDtypeStruct((b_pad, DATA_DIM), out_dtype),
        grid_spec=pltpu.PrefetchScalarGridSpec(
            num_scalar_prefetch=0,
            grid=(n_blocks,),
            in_specs=in_specs,
            out_specs=out_spec,
        ),
        compiler_params=pltpu.CompilerParams(
            dimension_semantics=("parallel",),
            vmem_limit_bytes=48 * 1024 * 1024,  # well under v7x 64 MiB physical
        ),
    )


# ---------------------------------------------------------------------------- forward
def decoder_forward(x, params, *, tile_m=None, out_dtype=jnp.float32):
    B, H = x.shape
    assert H == HIDDEN_DIM
    tm = _choose_tile_m(B) if tile_m is None else tile_m

    # Cast input once in the wrapper: halves input DMA bytes and removes the
    # in-kernel f32->bf16 cast of the layer-1 operand.
    xb = x.astype(jnp.bfloat16)

    n_blocks = pl.cdiv(B, tm)
    b_pad = n_blocks * tm
    if b_pad != B:
        # Only hit when tm does not divide B (the chooser avoids this when it can).
        xb = jnp.pad(xb, ((0, b_pad - B), (0, 0)))

    flat_params = []
    for (w, b) in params:
        flat_params += [w, b]

    fallback_errors = (TypeError, NotImplementedError, ValueError,
                       pltpu.LoweringException)
    try:
        out = _build_call(tm, n_blocks, b_pad, params, out_dtype,
                          single_buffer_weights=True)(xb, *flat_params)
    except fallback_errors:
        # Narrow fallback: only if pipeline_mode=pl.Buffered(1) is rejected by
        # this jax build (construction or lowering), rebuild double-buffered.
        out = _build_call(tm, n_blocks, b_pad, params, out_dtype,
                          single_buffer_weights=False)(xb, *flat_params)

    return out[:B] if b_pad != B else out


# -------------------------------------------------------------------------- reference
def decoder_reference(x, params):
    """Pure-JAX reference with the same bf16 rounding the kernel applies."""
    h = x.astype(jnp.bfloat16)
    n = len(params)
    for idx, (w, b) in enumerate(params):
        acc = jnp.dot(h.astype(jnp.float32), w.astype(jnp.float32)) + b
        if idx < n - 1:
            h = jnp.where(acc > 0, acc, LEAKY_SLOPE * acc).astype(jnp.bfloat16)
        else:
            h = jnp.tanh(acc)
    return h


if __name__ == "__main__":
    key = jax.random.PRNGKey(0)
    kx, kp = jax.random.split(key)

    params = init_params(kp)

    # Small batch -> single grid step (tile covers the whole batch).
    B = 16
    x = jax.random.normal(kx, (B, HIDDEN_DIM), jnp.float32)
    out = jax.block_until_ready(decoder_forward(x, params))
    ref = decoder_reference(x, params)
    assert out.shape == (B, DATA_DIM)
    assert jnp.allclose(out, ref, atol=3e-3, rtol=3e-3), "mismatch vs reference"

    # Ragged batch exercises the (small) pad path.
    B2 = 13
    x2 = jax.random.normal(kx, (B2, HIDDEN_DIM), jnp.float32)
    out2 = jax.block_until_ready(decoder_forward(x2, params))
    ref2 = decoder_reference(x2, params)
    assert out2.shape == (B2, DATA_DIM)
    assert jnp.allclose(out2, ref2, atol=3e-3, rtol=3e-3), "mismatch (ragged batch)"

    # Forced multi-block grid (3 steps, exact divide) exercises the pipelined path.
    B3 = 48
    x3 = jax.random.normal(kx, (B3, HIDDEN_DIM), jnp.float32)
    out3 = jax.block_until_ready(decoder_forward(x3, params, tile_m=16))
    ref3 = decoder_reference(x3, params)
    assert out3.shape == (B3, DATA_DIM)
    assert jnp.allclose(out3, ref3, atol=3e-3, rtol=3e-3), "mismatch (multi-block)"

    print("KERNEL_OK")
</pallas_src>

<mosaic_0001>
module attributes {stable_mosaic.version = 11 : i64} {
  func.func @decoder_kernel(%arg0: i32, %arg1: memref<16x32xbf16, #tpu.memory_space<vmem>>, %arg2: memref<32x64xbf16, #tpu.memory_space<vmem>>, %arg3: memref<1x64xf32, #tpu.memory_space<vmem>>, %arg4: memref<64x256xbf16, #tpu.memory_space<vmem>>, %arg5: memref<1x256xf32, #tpu.memory_space<vmem>>, %arg6: memref<256x256xbf16, #tpu.memory_space<vmem>>, %arg7: memref<1x256xf32, #tpu.memory_space<vmem>>, %arg8: memref<256x64xbf16, #tpu.memory_space<vmem>>, %arg9: memref<1x64xf32, #tpu.memory_space<vmem>>, %arg10: memref<64x16xbf16, #tpu.memory_space<vmem>>, %arg11: memref<1x16xf32, #tpu.memory_space<vmem>>, %arg12: memref<16x16xf32, #tpu.memory_space<vmem>>) attributes {dimension_semantics = [#tpu.dimension_semantics<parallel>], iteration_bounds = array<i64: 1>, scalar_prefetch = 0 : i64, scratch_operands = 0 : i64, tpu.core_type = #tpu.core_type<tc>, window_params = [{transform_indices = @transform_0, window_bounds = array<i64: 16, 32>}, {pipeline_mode = #tpu.pipeline_mode<synchronous>, transform_indices = @transform_1, window_bounds = array<i64: 32, 64>}, {pipeline_mode = #tpu.pipeline_mode<synchronous>, transform_indices = @transform_2, window_bounds = array<i64: 1, 64>}, {pipeline_mode = #tpu.pipeline_mode<synchronous>, transform_indices = @transform_3, window_bounds = array<i64: 64, 256>}, {pipeline_mode = #tpu.pipeline_mode<synchronous>, transform_indices = @transform_4, window_bounds = array<i64: 1, 256>}, {pipeline_mode = #tpu.pipeline_mode<synchronous>, transform_indices = @transform_5, window_bounds = array<i64: 256, 256>}, {pipeline_mode = #tpu.pipeline_mode<synchronous>, transform_indices = @transform_6, window_bounds = array<i64: 1, 256>}, {pipeline_mode = #tpu.pipeline_mode<synchronous>, transform_indices = @transform_7, window_bounds = array<i64: 256, 64>}, {pipeline_mode = #tpu.pipeline_mode<synchronous>, transform_indices = @transform_8, window_bounds = array<i64: 1, 64>}, {pipeline_mode = #tpu.pipeline_mode<synchronous>, transform_indices = @transform_9, window_bounds = array<i64: 64, 16>}, {pipeline_mode = #tpu.pipeline_mode<synchronous>, transform_indices = @transform_10, window_bounds = array<i64: 1, 16>}, {transform_indices = @transform_11, window_bounds = array<i64: 16, 16>}]} {
    %c0 = arith.constant 0 : index
    %c0_0 = arith.constant 0 : index
    %0 = vector.load %arg1[%c0, %c0_0] : memref<16x32xbf16, #tpu.memory_space<vmem>>, vector<16x32xbf16>
    %c0_1 = arith.constant 0 : index
    %c0_2 = arith.constant 0 : index
    %1 = vector.load %arg2[%c0_1, %c0_2] : memref<32x64xbf16, #tpu.memory_space<vmem>>, vector<32x64xbf16>
    %cst = arith.constant dense<0.000000e+00> : vector<16x64xf32>
    %2 = tpu.matmul %0, %1, %cst {dimension_numbers = #tpu.dot_dimension_numbers<[1], [0], [0], [1], [0, 0, 1, 1], [], []>} : vector<16x32xbf16>, vector<32x64xbf16>, vector<16x64xf32> -> vector<16x64xf32>
    %c0_3 = arith.constant 0 : index
    %c0_4 = arith.constant 0 : index
    %3 = vector.load %arg3[%c0_3, %c0_4] : memref<1x64xf32, #tpu.memory_space<vmem>>, vector<1x64xf32>
    %4 = vector.broadcast %3 : vector<1x64xf32> to vector<16x64xf32>
    %5 = arith.addf %2, %4 : vector<16x64xf32>
    %cst_5 = arith.constant 0.000000e+00 : f32
    %6 = vector.broadcast %cst_5 : f32 to vector<16x64xf32>
    %7 = arith.cmpf ogt, %5, %6 : vector<16x64xf32>
    %cst_6 = arith.constant 2.000000e-02 : f32
    %8 = vector.broadcast %cst_6 : f32 to vector<16x64xf32>
    %9 = arith.mulf %8, %5 : vector<16x64xf32>
    %10 = arith.select %7, %5, %9 : vector<16x64xi1>, vector<16x64xf32>
    %11 = arith.truncf %10 : vector<16x64xf32> to vector<16x64xbf16>
    %c0_7 = arith.constant 0 : index
    %c0_8 = arith.constant 0 : index
    %12 = vector.load %arg4[%c0_7, %c0_8] : memref<64x256xbf16, #tpu.memory_space<vmem>>, vector<64x256xbf16>
    %cst_9 = arith.constant dense<0.000000e+00> : vector<16x256xf32>
    %13 = tpu.matmul %11, %12, %cst_9 {dimension_numbers = #tpu.dot_dimension_numbers<[1], [0], [0], [1], [0, 0, 1, 1], [], []>} : vector<16x64xbf16>, vector<64x256xbf16>, vector<16x256xf32> -> vector<16x256xf32>
    %c0_10 = arith.constant 0 : index
    %c0_11 = arith.constant 0 : index
    %14 = vector.load %arg5[%c0_10, %c0_11] : memref<1x256xf32, #tpu.memory_space<vmem>>, vector<1x256xf32>
    %15 = vector.broadcast %14 : vector<1x256xf32> to vector<16x256xf32>
    %16 = arith.addf %13, %15 : vector<16x256xf32>
    %cst_12 = arith.constant 0.000000e+00 : f32
    %17 = vector.broadcast %cst_12 : f32 to vector<16x256xf32>
    %18 = arith.cmpf ogt, %16, %17 : vector<16x256xf32>
    %cst_13 = arith.constant 2.000000e-02 : f32
    %19 = vector.broadcast %cst_13 : f32 to vector<16x256xf32>
    %20 = arith.mulf %19, %16 : vector<16x256xf32>
    %21 = arith.select %18, %16, %20 : vector<16x256xi1>, vector<16x256xf32>
    %22 = arith.truncf %21 : vector<16x256xf32> to vector<16x256xbf16>
    %c0_14 = arith.constant 0 : index
    %c0_15 = arith.constant 0 : index
    %23 = vector.load %arg6[%c0_14, %c0_15] : memref<256x256xbf16, #tpu.memory_space<vmem>>, vector<256x256xbf16>
    %cst_16 = arith.constant dense<0.000000e+00> : vector<16x256xf32>
    %24 = tpu.matmul %22, %23, %cst_16 {dimension_numbers = #tpu.dot_dimension_numbers<[1], [0], [0], [1], [0, 0, 1, 1], [], []>} : vector<16x256xbf16>, vector<256x256xbf16>, vector<16x256xf32> -> vector<16x256xf32>
    %c0_17 = arith.constant 0 : index
    %c0_18 = arith.constant 0 : index
    %25 = vector.load %arg7[%c0_17, %c0_18] : memref<1x256xf32, #tpu.memory_space<vmem>>, vector<1x256xf32>
    %26 = vector.broadcast %25 : vector<1x256xf32> to vector<16x256xf32>
    %27 = arith.addf %24, %26 : vector<16x256xf32>
    %cst_19 = arith.constant 0.000000e+00 : f32
    %28 = vector.broadcast %cst_19 : f32 to vector<16x256xf32>
    %29 = arith.cmpf ogt, %27, %28 : vector<16x256xf32>
    %cst_20 = arith.constant 2.000000e-02 : f32
    %30 = vector.broadcast %cst_20 : f32 to vector<16x256xf32>
    %31 = arith.mulf %30, %27 : vector<16x256xf32>
    %32 = arith.select %29, %27, %31 : vector<16x256xi1>, vector<16x256xf32>
    %33 = arith.truncf %32 : vector<16x256xf32> to vector<16x256xbf16>
    %c0_21 = arith.constant 0 : index
    %c0_22 = arith.constant 0 : index
    %34 = vector.load %arg8[%c0_21, %c0_22] : memref<256x64xbf16, #tpu.memory_space<vmem>>, vector<256x64xbf16>
    %cst_23 = arith.constant dense<0.000000e+00> : vector<16x64xf32>
    %35 = tpu.matmul %33, %34, %cst_23 {dimension_numbers = #tpu.dot_dimension_numbers<[1], [0], [0], [1], [0, 0, 1, 1], [], []>} : vector<16x256xbf16>, vector<256x64xbf16>, vector<16x64xf32> -> vector<16x64xf32>
    %c0_24 = arith.constant 0 : index
    %c0_25 = arith.constant 0 : index
    %36 = vector.load %arg9[%c0_24, %c0_25] : memref<1x64xf32, #tpu.memory_space<vmem>>, vector<1x64xf32>
    %37 = vector.broadcast %36 : vector<1x64xf32> to vector<16x64xf32>
    %38 = arith.addf %35, %37 : vector<16x64xf32>
    %cst_26 = arith.constant 0.000000e+00 : f32
    %39 = vector.broadcast %cst_26 : f32 to vector<16x64xf32>
    %40 = arith.cmpf ogt, %38, %39 : vector<16x64xf32>
    %cst_27 = arith.constant 2.000000e-02 : f32
    %41 = vector.broadcast %cst_27 : f32 to vector<16x64xf32>
    %42 = arith.mulf %41, %38 : vector<16x64xf32>
    %43 = arith.select %40, %38, %42 : vector<16x64xi1>, vector<16x64xf32>
    %44 = arith.truncf %43 : vector<16x64xf32> to vector<16x64xbf16>
    %c0_28 = arith.constant 0 : index
    %c0_29 = arith.constant 0 : index
    %45 = vector.load %arg10[%c0_28, %c0_29] : memref<64x16xbf16, #tpu.memory_space<vmem>>, vector<64x16xbf16>
    %cst_30 = arith.constant dense<0.000000e+00> : vector<16x16xf32>
    %46 = tpu.matmul %44, %45, %cst_30 {dimension_numbers = #tpu.dot_dimension_numbers<[1], [0], [0], [1], [0, 0, 1, 1], [], []>} : vector<16x64xbf16>, vector<64x16xbf16>, vector<16x16xf32> -> vector<16x16xf32>
    %c0_31 = arith.constant 0 : index
    %c0_32 = arith.constant 0 : index
    %47 = vector.load %arg11[%c0_31, %c0_32] : memref<1x16xf32, #tpu.memory_space<vmem>>, vector<1x16xf32>
    %48 = vector.broadcast %47 : vector<1x16xf32> to vector<16x16xf32>
    %49 = arith.addf %46, %48 : vector<16x16xf32>
    %50 = math.tanh %49 : vector<16x16xf32>
    %c0_33 = arith.constant 0 : index
    %c0_34 = arith.constant 0 : index
    %51 = vector.load %arg12[%c0_33, %c0_34] : memref<16x16xf32, #tpu.memory_space<vmem>>, vector<16x16xf32>
    tpu.vector_store %arg12[%c0_33, %c0_34], %50 {strides = array<i32>} : memref<16x16xf32, #tpu.memory_space<vmem>>, vector<16x16xf32>,
    return
  }
  func.func @transform_0(%arg0: i32) -> (i32, i32) {
    %c0_i32 = arith.constant 0 : i32
    %c0_i32_0 = arith.constant 0 : i32
    return %arg0, %c0_i32 : i32, i32
  }
  func.func @transform_1(%arg0: i32) -> (i32, i32) {
    %c0_i32 = arith.constant 0 : i32
    %c0_i32_0 = arith.constant 0 : i32
    %c0_i32_1 = arith.constant 0 : i32
    return %c0_i32, %c0_i32_0 : i32, i32
  }
  func.func @transform_2(%arg0: i32) -> (i32, i32) {
    %c0_i32 = arith.constant 0 : i32
    %c0_i32_0 = arith.constant 0 : i32
    %c0_i32_1 = arith.constant 0 : i32
    return %c0_i32, %c0_i32_0 : i32, i32
  }
  func.func @transform_3(%arg0: i32) -> (i32, i32) {
    %c0_i32 = arith.constant 0 : i32
    %c0_i32_0 = arith.constant 0 : i32
    %c0_i32_1 = arith.constant 0 : i32
    return %c0_i32, %c0_i32_0 : i32, i32
  }
  func.func @transform_4(%arg0: i32) -> (i32, i32) {
    %c0_i32 = arith.constant 0 : i32
    %c0_i32_0 = arith.constant 0 : i32
    %c0_i32_1 = arith.constant 0 : i32
    return %c0_i32, %c0_i32_0 : i32, i32
  }
  func.func @transform_5(%arg0: i32) -> (i32, i32) {
    %c0_i32 = arith.constant 0 : i32
    %c0_i32_0 = arith.constant 0 : i32
    %c0_i32_1 = arith.constant 0 : i32
    return %c0_i32, %c0_i32_0 : i32, i32
  }
  func.func @transform_6(%arg0: i32) -> (i32, i32) {
    %c0_i32 = arith.constant 0 : i32
    %c0_i32_0 = arith.constant 0 : i32
    %c0_i32_1 = arith.constant 0 : i32
    return %c0_i32, %c0_i32_0 : i32, i32
  }
  func.func @transform_7(%arg0: i32) -> (i32, i32) {
    %c0_i32 = arith.constant 0 : i32
    %c0_i32_0 = arith.constant 0 : i32
    %c0_i32_1 = arith.constant 0 : i32
    return %c0_i32, %c0_i32_0 : i32, i32
  }
  func.func @transform_8(%arg0: i32) -> (i32, i32) {
    %c0_i32 = arith.constant 0 : i32
    %c0_i32_0 = arith.constant 0 : i32
    %c0_i32_1 = arith.constant 0 : i32
    return %c0_i32, %c0_i32_0 : i32, i32
  }
  func.func @transform_9(%arg0: i32) -> (i32, i32) {
    %c0_i32 = arith.constant 0 : i32
    %c0_i32_0 = arith.constant 0 : i32
    %c0_i32_1 = arith.constant 0 : i32
    return %c0_i32, %c0_i32_0 : i32, i32
  }
  func.func @transform_10(%arg0: i32) -> (i32, i32) {
    %c0_i32 = arith.constant 0 : i32
    %c0_i32_0 = arith.constant 0 : i32
    %c0_i32_1 = arith.constant 0 : i32
    return %c0_i32, %c0_i32_0 : i32, i32
  }
  func.func @transform_11(%arg0: i32) -> (i32, i32) {
    %c0_i32 = arith.constant 0 : i32
    %c0_i32_0 = arith.constant 0 : i32
    return %arg0, %c0_i32 : i32, i32
  }
}

</mosaic_0001>

<bundles_post_ra>
// kernel: tpu_custom_call.1
= control target key start
LH: loop header
LB: loop body
LE: loop exit
PB: predicated region body
PF: predicated region fallthrough
CT: control target
= control target key end

     0   :  { %16 = vsyncpa [#allocation3], 0  ;;  %s1284_s0 = inlined_call_operand.vmem [shape: bf16[16,32], index: 0, kind: input, shape index: {}]   ;;  %s1285_s1 = inlined_call_operand.vmem [shape: bf16[32,64], index: 1, kind: input, shape index: {}]   ;;  %s1286_s2 = inlined_call_operand.vmem [shape: f32[1,64], index: 2, kind: input, shape index: {}]   ;;  %s1287_s3 = inlined_call_operand.vmem [shape: bf16[64,256], index: 3, kind: input, shape index: {}]   ;;  %s1288_s4 = inlined_call_operand.vmem [shape: f32[1,256], index: 4, kind: input, shape index: {}]   ;;  %s1289_s5 = inlined_call_operand.hbm [shape: bf16[256,256], index: 5, kind: input, shape index: {}]   ;;  %s1290_s6 = inlined_call_operand.vmem [shape: f32[1,256], index: 6, kind: input, shape index: {}]   ;;  %s1291_s7 = inlined_call_operand.vmem [shape: bf16[256,64], index: 7, kind: input, shape index: {}]   ;;  %s1292_s8 = inlined_call_operand.vmem [shape: f32[1,64], index: 8, kind: input, shape index: {}]   ;;  %s1293_s9 = inlined_call_operand.vmem [shape: bf16[64,16], index: 9, kind: input, shape index: {}]   ;;  %s1294_s10 = inlined_call_operand.vmem [shape: f32[1,16], index: 10, kind: input, shape index: {}]   ;;  %s1295_s11 = inlined_call_operand.hbm [shape: f32[16,16], index: 11, kind: output, shape index: {}]  }
   0x1   :  { %17 = vsyncpa [#allocation4], 0  ;;  %s1067_s17 = smov [#allocation2]   ;;  %s1019_s21 = scalar_lea.hbm %s1289_s5, 4096 }
   0x2   :  { %s33_s18 = sshll.u32 %s1067_s17, 4  ;;  %p1020_p0 = scmp.ne.s32.totalorder %s1289_s5, %s1019_s21  ;;  %s34_s18 = int_to_ptr.vmem [resolvable:$true] %s33_s18 }
   0x3   :  { %p1023_p1 = scmp.lt.u32.totalorder %s1019_s21, %s1289_s5 }
   0x5   :  { %p1025_p2 = pnand %p1023_p1, %p1020_p0 }
   0x7   :  { %1028 = shalt.err (!%p1025_p2)
}
   0x8   :  { %s1029_s26 = scalar_lea.vmem %s34_s18, 4096  ;;  %p1034_p4 = scmp.lt.s32.totalorder %s34_s18, %s34_s18 }
   0x9   :  { %p1030_p3 = scmp.ne.s32.totalorder %s34_s18, %s1029_s26  ;;  %p1035_p5 = scmp.lt.s32.totalorder %s1029_s26, %s1029_s26 }
   0xb   :  { %p1036_p6 = por %p1035_p5, %p1034_p4 }
   0xd   :  { %p1037_p7 = pnand %p1036_p6, %p1030_p3 }
   0xf   :  { %1040 = shalt.err (!%p1037_p7)
}
  0x10   :  { %s1068_s27 = smov 128   ;;  %s1069_s28 = smov 8  }
  0x11   :  { %39 = dma.hbm_to_vmem [thread:$0]  %s1289_s5, 4096, %s34_s18, [#allocation3], %s1068_s27, %s1068_s27, %s1069_s28  }
  0x12   :  { %1063 = dma.done.wait [#allocation3], 4096  }
  0x13   :  { %1064 = vsyncadd [#allocation3], 4294963200  ;;  %v1070_v0 = vmov 0.0   ;;  %vm1071_vm0 = vmmov 0   ;;  %v932_v1 = vld [vmem:[%s1285_s1] sm:$0xff]   ;;  %v933_v2 = vld [vmem:[%s1285_s1 + $0x8] sm:$0xff]  }
  0x14   :  { %905 = vmatprep.subr.bf16.mxu0 %v1070_v0  ;;  %909 = vmatprep.mubr.msk.bf16.mxu0 %vm1071_vm0, %v1070_v0  ;;  %v935_v3 = vld [vmem:[%s1287_s3 + $0x4] ss:$8 sps:$4 sm:$0xff]   ;;  %v937_v4 = vld [vmem:[%s1287_s3] ss:$8 sps:$4 sm:$0xff]   ;;  %v938_v6 = vld [vmem:[%s1287_s3 + $0x14] ss:$8 sps:$4 sm:$0xff]  }
  0x15   :  { %906 = vmatpush3.bf16.msra.mxu0 %v932_v1  ;;  %v934_v5 = vld [vmem:[%s1284_s0] sm:$0xff]   ;;  %200 = vmatprep.subr.bf16.mxu1 %v935_v3  ;;  %v940_v7 = vld [vmem:[%s1287_s3 + $0x10] ss:$8 sps:$4 sm:$0xff]   ;;  %vm84_vm1 = vcmask 261120   ;;  %v944_v10 = vld [vmem:[%s1287_s3 + $0x34] ss:$8 sps:$4 sm:$0xff]  }
  0x16   :  { %907 = vmatprep.subr.bf16.mxu0 %v1070_v0  ;;  %201 = vmatpush1.bf16.msra.mxu1 %v937_v4  ;;  %v941_v8 = vld [vmem:[%s1287_s3 + $0x24] ss:$8 sps:$4 sm:$0xff]   ;;  %v943_v9 = vld [vmem:[%s1287_s3 + $0x20] ss:$8 sps:$4 sm:$0xff]   ;;  %v946_v11 = vld [vmem:[%s1287_s3 + $0x30] ss:$8 sps:$4 sm:$0xff]   ;;  %v146_v4 = vlaneseq }
  0x17   :  { %202 = vmatprep.subr.bf16.mxu1 %v938_v6  ;;  %v1072_v12 = vmov 0   ;;  %v947_v13 = vld [vmem:[#allocation2] ss:$8 sps:$4 sm:$0xff]   ;;  %v949_v14 = vld [vmem:[#allocation2 + $0x4] ss:$8 sps:$4 sm:$0xff]   ;;  %vm196_vm4 = vcmask 523264  }
  0x18   :  { %232 = vmatprep.mubr.bf16.mxu1 %v1072_v12  ;;  %v952_v15 = vld [vmem:[#allocation2 + $0x14] ss:$8 sps:$4 sm:$0xff]   ;;  %v950_v16 = vld [vmem:[#allocation2 + $0x10] ss:$8 sps:$4 sm:$0xff]   ;;  %v955_v17 = vld [vmem:[#allocation2 + $0x24] ss:$8 sps:$4 sm:$0xff]  }
  0x19   :  { %908 = vmatpush3.bf16.msra.mxu0 %v933_v2  ;;  %v953_v18 = vld [vmem:[#allocation2 + $0x20] ss:$8 sps:$4 sm:$0xff]   ;;  %v958_v19 = vld [vmem:[#allocation2 + $0x34] ss:$8 sps:$4 sm:$0xff]   ;;  %v956_v20 = vld [vmem:[#allocation2 + $0x30] ss:$8 sps:$4 sm:$0xff]  }
  0x1a   :  { %203 = vmatpush1.bf16.msra.mxu1 %v940_v7  ;;  %461 = vmatprep.subr.bf16.mxu0 %v949_v14  ;;  %v961_v21 = vld [vmem:[#allocation2 + $0x44] ss:$8 sps:$4 sm:$0xff]   ;;  %v959_v22 = vld [vmem:[#allocation2 + $0x40] ss:$8 sps:$4 sm:$0xff]   ;;  %v964_v23 = vld [vmem:[#allocation2 + $0x54] ss:$8 sps:$4 sm:$0xff]  }
  0x1b   :  { %204 = vmatprep.subr.bf16.mxu1 %v941_v8  ;;  %v962_v24 = vld [vmem:[#allocation2 + $0x50] ss:$8 sps:$4 sm:$0xff]   ;;  %v967_v25 = vld [vmem:[#allocation2 + $0x64] ss:$8 sps:$4 sm:$0xff]   ;;  %v965_v26 = vld [vmem:[#allocation2 + $0x60] ss:$8 sps:$4 sm:$0xff]  }
  0x1c   :  { %910 = vmatmul.mubr.msk.bf16.vlgmr.msra.gmra.mrb[0].mxu0 %vm84_vm1, %v934_v5  ;;  %v970_v27 = vld [vmem:[#allocation2 + $0x74] ss:$8 sps:$4 sm:$0xff]   ;;  %v968_v28 = vld [vmem:[#allocation2 + $0x70] ss:$8 sps:$4 sm:$0xff]   ;;  %v973_v29 = vld [vmem:[#allocation2 + $0x84] ss:$8 sps:$4 sm:$0xff]  }
  0x1d   :  { %462 = vmatpush1.bf16.msra.mxu0 %v947_v13  ;;  %v971_v30 = vld [vmem:[#allocation2 + $0x80] ss:$8 sps:$4 sm:$0xff]   ;;  %v976_v31 = vld [vmem:[#allocation2 + $0x94] ss:$8 sps:$4 sm:$0xff]   ;;  %v974_v32 = vld [vmem:[#allocation2 + $0x90] ss:$8 sps:$4 sm:$0xff]  }
  0x1e   :  { %205 = vmatpush1.bf16.msra.mxu1 %v943_v9  ;;  %463 = vmatprep.subr.bf16.mxu0 %v952_v15  ;;  %v979_v33 = vld [vmem:[#allocation2 + $0xa4] ss:$8 sps:$4 sm:$0xff]   ;;  %v977_v34 = vld [vmem:[#allocation2 + $0xa0] ss:$8 sps:$4 sm:$0xff]   ;;  %v982_v35 = vld [vmem:[#allocation2 + $0xb4] ss:$8 sps:$4 sm:$0xff]  }
  0x1f   :  { %206 = vmatprep.subr.bf16.mxu1 %v944_v10  ;;  %v980_v36 = vld [vmem:[#allocation2 + $0xb0] ss:$8 sps:$4 sm:$0xff]   ;;  %v985_v37 = vld [vmem:[#allocation2 + $0xc4] ss:$8 sps:$4 sm:$0xff]   ;;  %v983_v38 = vld [vmem:[#allocation2 + $0xc0] ss:$8 sps:$4 sm:$0xff]  }
  0x20   :  { %v806_v39 = vld [vmem:[%s1286_s2] ss:$0 sm:$0xff]  ;;  %v988_v51 = vld [vmem:[#allocation2 + $0xd4] ss:$8 sps:$4 sm:$0xff]   ;;  %v986_v52 = vld [vmem:[#allocation2 + $0xd0] ss:$8 sps:$4 sm:$0xff]  }
  0x21   :  { %464 = vmatpush1.bf16.msra.mxu0 %v950_v16  ;;  %v991_v53 = vld [vmem:[#allocation2 + $0xe4] ss:$8 sps:$4 sm:$0xff]   ;;  %v989_v54 = vld [vmem:[#allocation2 + $0xe0] ss:$8 sps:$4 sm:$0xff]   ;;  %v994_v55 = vld [vmem:[#allocation2 + $0xf4] ss:$8 sps:$4 sm:$0xff]  }
  0x22   :  { %207 = vmatpush1.bf16.msra.mxu1 %v946_v11  ;;  %465 = vmatprep.subr.bf16.mxu0 %v955_v17  ;;  %v992_v56 = vld [vmem:[#allocation2 + $0xf0] ss:$8 sps:$4 sm:$0xff]   ;;  %v995_v57 = vld [vmem:[%s1291_s7 + $0x40] sm:$0xff]   ;;  %v997_v59 = vld [vmem:[%s1291_s7 + $0x48] sm:$0xff]   ;;  %v147_v5 = vshrl.u32 %v146_v4, 7  ;;  %vm786_vm15 = vcmask 130048  }
  0x23   :  { %v996_v58 = vld [vmem:[%s1291_s7] sm:$0xff]   ;;  %878 = vmatprep.subr.bf16.mxu1 %v995_v57  ;;  %v998_v60 = vld [vmem:[%s1291_s7 + $0x8] sm:$0xff]   ;;  %v999_v61 = vld [vmem:[%s1291_s7 + $0x50] sm:$0xff]  }
  0x24   :  { %v1000_v62 = vld [vmem:[%s1291_s7 + $0x10] sm:$0xff]   ;;  %v1001_v63 = vld [vmem:[%s1291_s7 + $0x58] sm:$0xff]   ;;  %v1003_v2 = vld [vmem:[%s1291_s7 + $0x60] sm:$0xff]   ;;  %v148_v6 = vsub.s32 0, %v147_v5  ;;  %v152_v8 = vsub.s32 1, %v147_v5 }
  0x25   :  { %466 = vmatpush1.bf16.msra.mxu0 %v953_v18  ;;  %v1002_v1 = vld [vmem:[%s1291_s7 + $0x18] sm:$0xff]   ;;  %v1004_v3 = vld [vmem:[%s1291_s7 + $0x20] sm:$0xff]   ;;  %v1012_v57 = vld [vmem:[%s1293_s9 + $0x8] sm:$0xff]  }
  0x26   :  { %467 = vmatprep.subr.bf16.mxu0 %v958_v19  ;;  %v144_v7 = vld [vmem:[%s1288_s4] sm:$0x3] }
  0x27   :  { %v149_v9 = vrot.slane %v144_v7, %v148_v6  ;;  %v153_v10 = vrot.slane %v144_v7, %v152_v8 }
  0x29   :  { %468 = vmatpush1.bf16.msra.mxu0 %v956_v20 }
  0x2a   :  { %469 = vmatprep.subr.bf16.mxu0 %v961_v21 }
  0x2d   :  { %470 = vmatpush1.bf16.msra.mxu0 %v959_v22 }
  0x2e   :  { %471 = vmatprep.subr.bf16.mxu0 %v964_v23 }
  0x31   :  { %472 = vmatpush1.bf16.msra.mxu0 %v962_v24 }
  0x32   :  { %473 = vmatprep.subr.bf16.mxu0 %v967_v25 }
  0x35   :  { %474 = vmatpush1.bf16.msra.mxu0 %v965_v26 }
  0x36   :  { %475 = vmatprep.subr.bf16.mxu0 %v970_v27 }
  0x39   :  { %476 = vmatpush1.bf16.msra.mxu0 %v968_v28 }
  0x3a   :  { %477 = vmatprep.subr.bf16.mxu0 %v973_v29  ;;  %v1005_v29 = vld [vmem:[%s1291_s7 + $0x68] sm:$0xff]  }
  0x3d   :  { %478 = vmatpush1.bf16.msra.mxu0 %v971_v30  ;;  %v1006_v30 = vld [vmem:[%s1291_s7 + $0x28] sm:$0xff]  }
  0x3e   :  { %479 = vmatprep.subr.bf16.mxu0 %v976_v31  ;;  %v1007_v31 = vld [vmem:[%s1291_s7 + $0x70] sm:$0xff]  }
  0x41   :  { %480 = vmatpush1.bf16.msra.mxu0 %v974_v32  ;;  %v1008_v32 = vld [vmem:[%s1291_s7 + $0x30] sm:$0xff]  }
  0x42   :  { %481 = vmatprep.subr.bf16.mxu0 %v979_v33  ;;  %v1009_v33 = vld [vmem:[%s1291_s7 + $0x78] sm:$0xff]  }
  0x45   :  { %482 = vmatpush1.bf16.msra.mxu0 %v977_v34  ;;  %v1010_v34 = vld [vmem:[%s1291_s7 + $0x38] sm:$0xff]  }
  0x46   :  { %483 = vmatprep.subr.bf16.mxu0 %v982_v35  ;;  %v289_v35 = vld [vmem:[%s1290_s6] sm:$0x3] }
  0x49   :  { %484 = vmatpush1.bf16.msra.mxu0 %v980_v36  ;;  %v294_v36 = vrot.slane %v289_v35, %v148_v6 }
  0x4a   :  { %485 = vmatprep.subr.bf16.mxu0 %v985_v37  ;;  %v298_v37 = vrot.slane %v289_v35, %v152_v8 }
  0x4d   :  { %486 = vmatpush1.bf16.msra.mxu0 %v983_v38 }
  0x4e   :  { %487 = vmatprep.subr.bf16.mxu0 %v988_v51 }
  0x51   :  { %488 = vmatpush1.bf16.msra.mxu0 %v986_v52 }
  0x52   :  { %489 = vmatprep.subr.bf16.mxu0 %v991_v53 }
  0x55   :  { %490 = vmatpush1.bf16.msra.mxu0 %v989_v54 }
  0x56   :  { %491 = vmatprep.subr.bf16.mxu0 %v994_v55 }
  0x59   :  { %492 = vmatpush1.bf16.msra.mxu0 %v992_v56  ;;  %v1011_v56 = vld [vmem:[%s1293_s9] sm:$0xff]  }
  0xef   :  { %v122_v40 = vpop.f32.mrb[0].mxu0 }
  0xf0   :  { %v123_v41 = vadd.f32 %v806_v39, %v122_v40  ;;  %v911_v42 = vpop.f32.mrb[1].mxu0 }
  0xf1   :  { %v125_v43 = vpop.f32.mrb[2].mxu0 }
  0xf2   :  { %v131_v44 = vmul.f32 0.02, %v123_v41  ;;  %v126_v45 = vadd.f32 %v806_v39, %v125_v43  ;;  %v912_v46 = vpop.f32.mrb[3].mxu0  ;;  %vm129_vm2 = vcmp.gt.f32.partialorder %v123_v41, 0.0 }
  0xf4   :  { %vm130_vm3 = vcmp.gt.f32.partialorder %v126_v45, 0.0  ;;  %v132_v47 = vmul.f32 0.02, %v126_v45  ;;  %v133_v48 = vsel %vm129_vm2, %v123_v41, %v131_v44 }
  0xf6   :  { %v134_v49 = vsel %vm130_vm3, %v126_v45, %v132_v47 }
  0xf7   :  { %v135_v50 = vpack.c.bf16 %v134_v49, %v133_v48 }
  0xf9   :  { %819 = vmatmul.mubr.msk.bf16.vlgmr.msra.gmra.mrb[0].mxu1 %vm196_vm4, %v135_v50 }
  0xfa   :  { %879 = vmatpush3.bf16.msra.mxu1 %v996_v58  ;;  %v1013_v58 = vld [vmem:[%s1293_s9 + $0x10] sm:$0xff]  }
  0xfb   :  { %880 = vmatprep.subr.bf16.mxu1 %v997_v59  ;;  %v1014_v59 = vld [vmem:[%s1293_s9 + $0x18] sm:$0xff]  }
  0xfe   :  { %881 = vmatpush3.bf16.msra.mxu1 %v998_v60 }
  0xff   :  { %882 = vmatprep.subr.bf16.mxu1 %v999_v61  ;;  %v852_v61 = vld [vmem:[%s1292_s8] ss:$0 sm:$0xff]  ;;  %s1073_s8 = smov [#allocation5]  }
 0x100   :  { %s794_s4 = sshll.u32 %s1073_s8, 4  ;;  %s795_s4 = int_to_ptr.vmem [resolvable:$true] %s794_s4 }
 0x101   :  { %s1041_s2 = scalar_lea.vmem %s795_s4, 256  ;;  %p1046_p9 = scmp.lt.s32.totalorder %s795_s4, %s795_s4 }
 0x102   :  { %883 = vmatpush3.bf16.msra.mxu1 %v1000_v62  ;;  %p1042_p8 = scmp.ne.s32.totalorder %s795_s4, %s1041_s2  ;;  %p1047_p10 = scmp.lt.s32.totalorder %s1041_s2, %s1041_s2 }
 0x103   :  { %884 = vmatprep.subr.bf16.mxu1 %v1001_v63 }
 0x104   :  { %p1048_p11 = por %p1047_p10, %p1046_p9 }
 0x106   :  { %885 = vmatpush3.bf16.msra.mxu1 %v1002_v1  ;;  %p1049_p12 = pnand %p1048_p11, %p1042_p8 }
 0x107   :  { %886 = vmatprep.subr.bf16.mxu1 %v1003_v2 }
 0x10a   :  { %887 = vmatpush3.bf16.msra.mxu1 %v1004_v3 }
 0x10b   :  { %888 = vmatprep.subr.bf16.mxu1 %v1005_v29 }
 0x10e   :  { %889 = vmatpush3.bf16.msra.mxu1 %v1006_v30 }
 0x10f   :  { %890 = vmatprep.subr.bf16.mxu1 %v1007_v31 }
 0x112   :  { %891 = vmatpush3.bf16.msra.mxu1 %v1008_v32 }
 0x113   :  { %892 = vmatprep.subr.bf16.mxu1 %v1009_v33 }
 0x116   :  { %893 = vmatpush3.bf16.msra.mxu1 %v1010_v34 }
 0x117   :  { %913 = vmatprep.subr.bf16.mxu1 %v1070_v0 }
 0x1cc   :  { %v234_v11 = vpop.f32.mrb[0].mxu1 }
 0x1cd   :  { %v235_v12 = vadd.f32 %v234_v11, %v149_v9  ;;  %v236_v13 = vpop.f32.mrb[1].mxu1 }
 0x1ce   :  { %v237_v14 = vadd.f32 %v236_v13, %v153_v10  ;;  %v238_v15 = vpop.f32.mrb[2].mxu1 }
 0x1cf   :  { %v247_v16 = vmul.f32 0.02, %v235_v12  ;;  %v239_v17 = vadd.f32 %v238_v15, %v149_v9  ;;  %v240_v18 = vpop.f32.mrb[3].mxu1  ;;  %vm243_vm5 = vcmp.gt.f32.partialorder %v235_v12, 0.0 }
 0x1d0   :  { %v248_v19 = vmul.f32 0.02, %v237_v14  ;;  %v241_v20 = vadd.f32 %v240_v18, %v153_v10  ;;  %vm244_vm6 = vcmp.gt.f32.partialorder %v237_v14, 0.0  ;;  %v869_v10 = vld [vmem:[%s1294_s10] ss:$0 sm:$0xff] }
 0x1d1   :  { %vm245_vm7 = vcmp.gt.f32.partialorder %v239_v17, 0.0  ;;  %v249_v21 = vmul.f32 0.02, %v239_v17  ;;  %v251_v23 = vsel %vm243_vm5, %v235_v12, %v247_v16 }
 0x1d2   :  { %vm246_vm8 = vcmp.gt.f32.partialorder %v241_v20, 0.0  ;;  %v250_v22 = vmul.f32 0.02, %v241_v20  ;;  %v252_v26 = vsel %vm244_vm6, %v237_v14, %v248_v19 }
 0x1d3   :  { %v253_v24 = vsel %vm245_vm7, %v239_v17, %v249_v21 }
 0x1d4   :  { %v255_v25 = vpack.c.bf16 %v253_v24, %v251_v23  ;;  %v254_v27 = vsel %vm246_vm8, %v241_v20, %v250_v22 }
 0x1d5   :  { %v256_v28 = vpack.c.bf16 %v254_v27, %v252_v26 }
 0x1d7   :  { %493 = vmatprep.mubr.bf16.mxu0 %v256_v28 }
 0x1d8   :  { %494 = vmatmul.mubr.bf16.vlgmr.msra.gmra.mrb[4].mxu0 %v255_v25 }
 0x2ab   :  { %v495_v38 = vpop.f32.mrb[4].mxu0 }
 0x2ac   :  { %v496_v39 = vadd.f32 %v495_v38, %v294_v36  ;;  %v497_v40 = vpop.f32.mrb[5].mxu0 }
 0x2ad   :  { %v498_v41 = vadd.f32 %v497_v40, %v298_v37  ;;  %v499_v42 = vpop.f32.mrb[6].mxu0 }
 0x2ae   :  { %v508_v43 = vmul.f32 0.02, %v496_v39  ;;  %v500_v44 = vadd.f32 %v499_v42, %v294_v36  ;;  %v501_v45 = vpop.f32.mrb[7].mxu0  ;;  %vm504_vm9 = vcmp.gt.f32.partialorder %v496_v39, 0.0 }
 0x2af   :  { %v509_v46 = vmul.f32 0.02, %v498_v41  ;;  %v502_v47 = vadd.f32 %v501_v45, %v298_v37  ;;  %vm505_vm10 = vcmp.gt.f32.partialorder %v498_v41, 0.0 }
 0x2b0   :  { %vm506_vm11 = vcmp.gt.f32.partialorder %v500_v44, 0.0  ;;  %v510_v48 = vmul.f32 0.02, %v500_v44  ;;  %v512_v50 = vsel %vm504_vm9, %v496_v39, %v508_v43 }
 0x2b1   :  { %vm507_vm12 = vcmp.gt.f32.partialorder %v502_v47, 0.0  ;;  %v511_v49 = vmul.f32 0.02, %v502_v47  ;;  %v513_v53 = vsel %vm505_vm10, %v498_v41, %v509_v46 }
 0x2b2   :  { %v514_v51 = vsel %vm506_vm11, %v500_v44, %v510_v48 }
 0x2b3   :  { %v516_v52 = vpack.c.bf16 %v514_v51, %v512_v50  ;;  %v515_v54 = vsel %vm507_vm12, %v502_v47, %v511_v49 }
 0x2b4   :  { %v517_v55 = vpack.c.bf16 %v515_v54, %v513_v53 }
 0x2b6   :  { %685 = vmatprep.mubr.bf16.mxu1 %v517_v55 }
 0x2b7   :  { %686 = vmatmul.mubr.bf16.vlgmr.msra.gmra.mrb[4].mxu1 %v516_v52 }
 0x2b8   :  { %914 = vmatpush3.bf16.msra.mxu1 %v1011_v56  ;;  %921 = vmatprep.mubr.msk.bf16.mxu1 %vm1071_vm0, %v1070_v0 }
 0x2b9   :  { %915 = vmatprep.subr.bf16.mxu1 %v1070_v0 }
 0x2bc   :  { %916 = vmatpush3.bf16.msra.mxu1 %v1012_v57 }
 0x2bd   :  { %917 = vmatprep.subr.bf16.mxu1 %v1070_v0 }
 0x2c0   :  { %918 = vmatpush3.bf16.msra.mxu1 %v1013_v58 }
 0x2c1   :  { %919 = vmatprep.subr.bf16.mxu1 %v1070_v0 }
 0x2c4   :  { %920 = vmatpush3.bf16.msra.mxu1 %v1014_v59 }
 0x38a   :  { %v894_v60 = vpop.f32.mrb[4].mxu1 }
 0x38b   :  { %v895_v62 = vpop.f32.mrb[5].mxu1 }
 0x38c   :  { %v896_v63 = vadd.f32 %v895_v62, %v894_v60  ;;  %v897_v1 = vpop.f32.mrb[6].mxu1 }
 0x38d   :  { %v898_v2 = vpop.f32.mrb[7].mxu1 }
 0x38e   :  { %v688_v3 = vadd.f32 %v896_v63, %v852_v61  ;;  %v899_v4 = vadd.f32 %v898_v2, %v897_v1 }
 0x390   :  { %v696_v5 = vmul.f32 0.02, %v688_v3  ;;  %v691_v6 = vadd.f32 %v899_v4, %v852_v61  ;;  %vm694_vm13 = vcmp.gt.f32.partialorder %v688_v3, 0.0 }
 0x392   :  { %vm695_vm14 = vcmp.gt.f32.partialorder %v691_v6, 0.0  ;;  %v697_v0 = vmul.f32 0.02, %v691_v6  ;;  %v698_v7 = vsel %vm694_vm13, %v688_v3, %v696_v5 }
 0x394   :  { %v699_v8 = vsel %vm695_vm14, %v691_v6, %v697_v0 }
 0x395   :  { %v700_v9 = vpack.c.bf16 %v699_v8, %v698_v7 }
 0x397   :  { %922 = vmatmul.mubr.msk.bf16.vlgmr.msra.gmra.mrb[8].mxu1 %vm196_vm4, %v700_v9 }
 0x46a   :  { %v777_v11 = vpop.f32.mrb[8].mxu1 }
 0x46b   :  { %v778_v12 = vadd.f32 %v869_v10, %v777_v11  ;;  %v923_v13 = vpop.f32.mrb[9].mxu1 }
 0x46c   :  { %v780_v14 = vpop.f32.mrb[10].mxu1 }
 0x46d   :  { %1015 = vtanh.f32 %v778_v12  ;;  %v781_v15 = vadd.f32 %v869_v10, %v780_v14  ;;  %v924_v16 = vpop.f32.mrb[11].mxu1 }
 0x46f   :  { %1017 = vtanh.f32 %v781_v15 }
 0x477   :  { %v1016_v17 = vpop.eup %1015 }
 0x478   :  { %787 = vst.msk [vmem:[#allocation5] sm:$0xff] %vm786_vm15, %v1016_v17 }
 0x479   :  { %v1018_v18 = vpop.eup %1017 }
 0x47a   :  { %788 = vst.msk [vmem:[#allocation5 + $0x8] sm:$0xff] %vm786_vm15, %v1018_v18 }
 0x47b   :  { %1052 = shalt.err (!%p1049_p12)
}
 0x47c   :  { %s1053_s5 = scalar_lea.hbm %s1295_s11, 256 }
 0x47d   :  { %p1054_p13 = scmp.ne.s32.totalorder %s1295_s11, %s1053_s5  ;;  %p1057_p0 = scmp.lt.u32.totalorder %s1053_s5, %s1295_s11 }
 0x47f   :  { %p1059_p1 = pnand %p1057_p0, %p1054_p13 }
 0x481   :  { %1062 = shalt.err (!%p1059_p1)
}
 0x482   :  { %800 = dma.vmem_to_hbm [thread:$0]  %s795_s4, 256, %s1295_s11, [#allocation4], %s1068_s27, %s1068_s27, %s1069_s28  }
 0x483   :  { %1065 = dma.done.wait [#allocation4], 256  }
 0x484   :  { %1066 = vsyncadd [#allocation4], 4294967040 }
 0x485   :  { %804 = vsyncpa [#allocation3], 1 }
 0x486   :  { %805 = vsyncpa [#allocation4], 1 }

</bundles_post_ra>
